<compile_context>
chip_gen: v5e
topology: v5e:2x2
jax: 0.10.0
libtpu: 0.0.40
codegen_flags: <defaults>
</compile_context>

<pallas_src>
import functools

import jax
import jax.numpy as jnp
from jax.experimental import pallas as pl
from jax.experimental.pallas import tpu as pltpu


def _round_up(x, m):
    return ((x + m - 1) // m) * m


def _cdiv(a, b):
    return (a + b - 1) // b


def _dc_loss_kernel(pred_ref, targ_ref, pt_ref, p_ref, t_ref, ce_ref,
                    *, s_true, tile_s, tiles_per_slice, one_hot_target):
    """Grid = (num_slices ["parallel"], tiles_per_slice ["arbitrary"]).

    Per-slice partial sums accumulate directly in the (1,B,C)/(1,B,1) output
    blocks (resident in VMEM across the inner 'arbitrary' axis); the scalar
    dice/CE combination happens in plain JAX outside the kernel so the outer
    axis can be sharded across TensorCores (v7x megacore).
    """
    s_idx = pl.program_id(1)

    @pl.when(s_idx == 0)
    def _init():
        pt_ref[...] = jnp.zeros_like(pt_ref)
        p_ref[...] = jnp.zeros_like(p_ref)
        t_ref[...] = jnp.zeros_like(t_ref)
        ce_ref[...] = jnp.zeros_like(ce_ref)

    pred = pred_ref[...].astype(jnp.float32)            # (B, C, T)
    targ = targ_ref[...].astype(jnp.float32)            # (B, C, T)
    B, C, T = pred.shape

    # ---------------- dice partial sums ----------------
    # inter + 0.5*fp + 0.5*fn == 0.5*(sum(pred) + sum(targ)) -> three sums only.
    pt = pred * targ
    pt_ref[...] += jnp.sum(pt, axis=-1)[None]            # (1, B, C)
    p_ref[...] += jnp.sum(pred, axis=-1)[None]
    t_ref[...] += jnp.sum(targ, axis=-1)[None]

    # ------- NLL partial sum: log(pred + 1e-8) at argmax(target, dim=1) -------
    if one_hot_target:
        # Exactly one-hot targets: pred at argmax(target) == sum_c pred*target;
        # reuses the pred*targ product already computed for dice.
        sel = jnp.sum(pt, axis=1)                         # (B, T)
    else:
        # Vectorised first-max-wins argmax (matches torch/jnp tie-breaking).
        ch = jax.lax.broadcasted_iota(jnp.int32, (B, C, T), 1).astype(jnp.float32)
        max_t = jnp.max(targ, axis=1, keepdims=True)                     # (B,1,T)
        first_idx = jnp.min(jnp.where(targ >= max_t, ch, jnp.float32(C)),
                            axis=1, keepdims=True)                       # (B,1,T)
        sel = jnp.sum(jnp.where(ch == first_idx, pred, 0.0), axis=1)     # (B, T)

    # Pay for the padding-lane mask only on tiles that extend past S.
    start = (pl.program_id(0) * tiles_per_slice + s_idx) * tile_s
    has_pad = start + tile_s > s_true

    @pl.when(jnp.logical_not(has_pad))
    def _ce_full():
        ce_ref[...] += jnp.sum(jnp.log(sel + 1e-8), axis=-1, keepdims=True)[None]

    @pl.when(has_pad)
    def _ce_masked():
        lane = jax.lax.broadcasted_iota(jnp.int32, sel.shape, 1) + start
        logp = jnp.where(lane < s_true, jnp.log(sel + 1e-8), 0.0)
        ce_ref[...] += jnp.sum(logp, axis=-1, keepdims=True)[None]


def dc_loss(pred, target, n=1, *, tile_s=None, num_slices=None,
            one_hot_target=False, storage_dtype=None):
    """pred, target: (B, C, D, H, W). Returns scalar == DCLoss(n).forward.

    storage_dtype: optional dtype (e.g. jnp.bfloat16) for the streamed HBM
      copies of pred/target; accumulation stays f32 in-kernel (halves DMA bytes
      on bandwidth-bound v5e/v6e at ~1e-3-level loss error).
    one_hot_target: set True when `target` is exactly one-hot to use the cheap
      CE selection path (sum_c pred*target).
    """
    B, C = pred.shape[0], pred.shape[1]
    assert C > n, "DCLoss requires pred.shape[1] > n"
    S = 1
    for d in pred.shape[2:]:
        S *= d

    if storage_dtype is not None:
        pred = pred.astype(storage_dtype)
        target = target.astype(storage_dtype)
    pred2 = pred.reshape(B, C, S)
    targ2 = target.reshape(B, C, S)
    itemsize = jnp.dtype(pred2.dtype).itemsize

    # ---- generation-aware VMEM budget -> tile size ----
    try:
        vmem_cap = int(pltpu.get_tpu_info().vmem_capacity_bytes)
    except Exception:
        vmem_cap = 64 * 1024 * 1024            # conservative (v7x physical)
    vmem_budget = ((vmem_cap * 7) // 8) // 2   # half of (cap - headroom)

    # Bytes per streamed spatial column: 2 inputs x 2 pipeline buffers in the
    # storage dtype + in-kernel f32 temporaries (casts, product, argmax chain).
    n_tmp = 5 if one_hot_target else 8
    bytes_per_col = B * C * (2 * 2 * itemsize + n_tmp * 4)
    if tile_s is None:
        tile_s = max(128, (vmem_budget // bytes_per_col) // 128 * 128)
        tile_s = min(tile_s, 64 * 1024, _round_up(S, 128))
    else:
        tile_s = _round_up(tile_s, 128)

    total_tiles = _cdiv(S, tile_s)
    if num_slices is None:
        num_slices = 2 if total_tiles >= 2 else 1   # feed both v7x TensorCores
    num_slices = max(1, min(num_slices, total_tiles))
    tiles_per_slice = _cdiv(total_tiles, num_slices)
    s_pad = num_slices * tiles_per_slice * tile_s

    if s_pad != S:
        # Zero padding: dice sums unaffected; CE lanes masked in-kernel.
        pad = ((0, 0), (0, 0), (0, s_pad - S))
        pred2 = jnp.pad(pred2, pad)
        targ2 = jnp.pad(targ2, pad)

    est_vmem = (2 * 2 * B * C * tile_s * itemsize        # pipelined input bufs
                + n_tmp * B * C * tile_s * 4              # f32 temporaries
                + 4 * num_slices * B * C * 4)             # output accumulators
    vmem_limit = int(min(max(32 * 1024 * 1024, est_vmem + 8 * 1024 * 1024),
                         (vmem_cap * 7) // 8))

    in_block = pl.BlockSpec((B, C, tile_s),
                            lambda p, s: (0, 0, p * tiles_per_slice + s))
    acc_block = pl.BlockSpec((1, B, C), lambda p, s: (p, 0, 0))
    ce_block = pl.BlockSpec((1, B, 1), lambda p, s: (p, 0, 0))

    pt_p, p_p, t_p, ce_p = pl.pallas_call(
        functools.partial(_dc_loss_kernel, s_true=S, tile_s=tile_s,
                          tiles_per_slice=tiles_per_slice,
                          one_hot_target=one_hot_target),
        out_shape=(
            jax.ShapeDtypeStruct((num_slices, B, C), jnp.float32),   # Σ pred*targ
            jax.ShapeDtypeStruct((num_slices, B, C), jnp.float32),   # Σ pred
            jax.ShapeDtypeStruct((num_slices, B, C), jnp.float32),   # Σ targ
            jax.ShapeDtypeStruct((num_slices, B, 1), jnp.float32),   # Σ log p@label
        ),
        grid_spec=pltpu.PrefetchScalarGridSpec(
            num_scalar_prefetch=0,
            grid=(num_slices, tiles_per_slice),
            in_specs=[in_block, in_block],
            out_specs=[acc_block, acc_block, acc_block, ce_block],
        ),
        compiler_params=pltpu.CompilerParams(
            dimension_semantics=("parallel", "arbitrary"),  # S-tiles are a reduction
            vmem_limit_bytes=vmem_limit,
        ),
    )(pred2, targ2)

    # ---- tiny epilogue in plain JAX (outside the kernel) ----
    inter = jnp.sum(pt_p, axis=0)                                   # (B, C)
    denom = 0.5 * (jnp.sum(p_p, axis=0) + jnp.sum(t_p, axis=0))
    # NOTE: matches torch precedence — smooth=1 added OUTSIDE the ratio.
    dice_per = inter / denom + 1.0                                   # (B, C)
    dice = jnp.sum(dice_per[:, n:], axis=1) / (C - n)                # (B,)
    ce = -jnp.sum(ce_p) / (B * S)                                    # NLL mean
    return -jnp.mean(dice) + ce


def _dc_loss_reference(pred, target, n=1):
    """Pure-JAX replica of the PyTorch forward, for correctness check."""
    B, C = pred.shape[0], pred.shape[1]
    p = pred.reshape(B, C, -1).astype(jnp.float32)
    t = target.reshape(B, C, -1).astype(jnp.float32)
    inter = jnp.sum(p * t, axis=-1)
    fp = jnp.sum(p * (1.0 - t), axis=-1)
    fn = jnp.sum((1.0 - p) * t, axis=-1)
    dice_per = inter / (inter + 0.5 * fp + 0.5 * fn) + 1.0
    dice = jnp.sum(dice_per[:, n:], axis=1) / (C - n)
    labels = jnp.argmax(t, axis=1)                        # (B, S)
    logp = jnp.log(p + 1e-8)
    picked = jnp.take_along_axis(logp, labels[:, None], axis=1)[:, 0]
    ce = -jnp.mean(picked)
    return -jnp.mean(dice) + ce


if __name__ == "__main__":
    key = jax.random.PRNGKey(0)
    k1p, k1l, k2p, k2l = jax.random.split(key, 4)

    # --- case 1: S=1024, tile_s=256 -> 2x2 grid (parallel slices + accumulators)
    B, C, D, H, W = 2, 4, 4, 16, 16
    logits = jax.random.normal(k1p, (B, C, D, H, W), dtype=jnp.float32)
    pred = jax.nn.softmax(logits, axis=1)                 # probabilities
    labels = jax.random.randint(k1l, (B, D, H, W), 0, C)
    target = jax.nn.one_hot(labels, C, axis=1, dtype=jnp.float32)
    ref = _dc_loss_reference(pred, target, n=1)

    loss = jax.block_until_ready(dc_loss(pred, target, n=1, tile_s=256))
    assert jnp.isfinite(loss), "non-finite loss (general path)"
    assert abs(float(loss) - float(ref)) < 5e-4, (float(loss), float(ref))

    # same inputs, cheap one-hot CE selection path
    loss_oh = jax.block_until_ready(
        dc_loss(pred, target, n=1, tile_s=256, one_hot_target=True))
    assert abs(float(loss_oh) - float(ref)) < 5e-4, (float(loss_oh), float(ref))

    # --- case 2: uneven S=300 -> padding + lane masking + a fully-padded tile
    D2, H2, W2 = 3, 10, 10
    logits2 = jax.random.normal(k2p, (B, C, D2, H2, W2), dtype=jnp.float32)
    pred_b = jax.nn.softmax(logits2, axis=1)
    labels2 = jax.random.randint(k2l, (B, D2, H2, W2), 0, C)
    target_b = jax.nn.one_hot(labels2, C, axis=1, dtype=jnp.float32)
    ref2 = _dc_loss_reference(pred_b, target_b, n=1)

    loss2 = jax.block_until_ready(dc_loss(pred_b, target_b, n=1, tile_s=128))
    assert jnp.isfinite(loss2), "non-finite loss (padded case)"
    assert abs(float(loss2) - float(ref2)) < 5e-4, (float(loss2), float(ref2))

    # --- case 3: bf16 HBM storage (halves DMA on v5e/v6e), looser tolerance
    loss3 = jax.block_until_ready(
        dc_loss(pred, target, n=1, tile_s=256, storage_dtype=jnp.bfloat16,
                one_hot_target=True))
    assert jnp.isfinite(loss3), "non-finite loss (bf16 case)"
    assert abs(float(loss3) - float(ref)) < 1e-2, (float(loss3), float(ref))

    # --- case 4: automatic VMEM-budgeted tile sizing (single big tile)
    loss4 = jax.block_until_ready(dc_loss(pred, target, n=1))
    assert abs(float(loss4) - float(ref)) < 5e-4, (float(loss4), float(ref))

    print("KERNEL_OK")
</pallas_src>

<mosaic_0001>
module attributes {stable_mosaic.version = 11 : i64} {
  func.func @_dc_loss_kernel(%arg0: i32, %arg1: i32, %arg2: memref<2x4x256xf32, #tpu.memory_space<vmem>>, %arg3: memref<2x4x256xf32, #tpu.memory_space<vmem>>, %arg4: memref<1x2x4xf32, #tpu.memory_space<vmem>>, %arg5: memref<1x2x4xf32, #tpu.memory_space<vmem>>, %arg6: memref<1x2x4xf32, #tpu.memory_space<vmem>>, %arg7: memref<1x2x1xf32, #tpu.memory_space<vmem>>) attributes {dimension_semantics = [#tpu.dimension_semantics<parallel>, #tpu.dimension_semantics<arbitrary>], iteration_bounds = array<i64: 2, 2>, scalar_prefetch = 0 : i64, scratch_operands = 0 : i64, tpu.core_type = #tpu.core_type<tc>, window_params = [{transform_indices = @transform_0, window_bounds = array<i64: 2, 4, 256>}, {transform_indices = @transform_1, window_bounds = array<i64: 2, 4, 256>}, {transform_indices = @transform_2, window_bounds = array<i64: 1, 2, 4>}, {transform_indices = @transform_3, window_bounds = array<i64: 1, 2, 4>}, {transform_indices = @transform_4, window_bounds = array<i64: 1, 2, 4>}, {transform_indices = @transform_5, window_bounds = array<i64: 1, 2, 1>}]} {
    %c0_i32 = arith.constant 0 : i32
    %0 = arith.cmpi eq, %arg1, %c0_i32 : i32
    %1 = arith.extui %0 : i1 to i32
    %c0_i32_0 = arith.constant 0 : i32
    %2 = arith.cmpi ne, %1, %c0_i32_0 : i32
    scf.if %2 {
      %cst_34 = arith.constant 0.000000e+00 : f32
      %46 = vector.broadcast %cst_34 : f32 to vector<1x2x4xf32>
      %c0_35 = arith.constant 0 : index
      %c0_36 = arith.constant 0 : index
      %c0_37 = arith.constant 0 : index
      %47 = vector.load %arg4[%c0_35, %c0_36, %c0_37] : memref<1x2x4xf32, #tpu.memory_space<vmem>>, vector<1x2x4xf32>
      tpu.vector_store %arg4[%c0_35, %c0_36, %c0_37], %46 {strides = array<i32>} : memref<1x2x4xf32, #tpu.memory_space<vmem>>, vector<1x2x4xf32>,
      %cst_38 = arith.constant 0.000000e+00 : f32
      %48 = vector.broadcast %cst_38 : f32 to vector<1x2x4xf32>
      %c0_39 = arith.constant 0 : index
      %c0_40 = arith.constant 0 : index
      %c0_41 = arith.constant 0 : index
      %49 = vector.load %arg5[%c0_39, %c0_40, %c0_41] : memref<1x2x4xf32, #tpu.memory_space<vmem>>, vector<1x2x4xf32>
      tpu.vector_store %arg5[%c0_39, %c0_40, %c0_41], %48 {strides = array<i32>} : memref<1x2x4xf32, #tpu.memory_space<vmem>>, vector<1x2x4xf32>,
      %cst_42 = arith.constant 0.000000e+00 : f32
      %50 = vector.broadcast %cst_42 : f32 to vector<1x2x4xf32>
      %c0_43 = arith.constant 0 : index
      %c0_44 = arith.constant 0 : index
      %c0_45 = arith.constant 0 : index
      %51 = vector.load %arg6[%c0_43, %c0_44, %c0_45] : memref<1x2x4xf32, #tpu.memory_space<vmem>>, vector<1x2x4xf32>
      tpu.vector_store %arg6[%c0_43, %c0_44, %c0_45], %50 {strides = array<i32>} : memref<1x2x4xf32, #tpu.memory_space<vmem>>, vector<1x2x4xf32>,
      %cst_46 = arith.constant 0.000000e+00 : f32
      %52 = vector.broadcast %cst_46 : f32 to vector<1x2x1xf32>
      %c0_47 = arith.constant 0 : index
      %c0_48 = arith.constant 0 : index
      %c0_49 = arith.constant 0 : index
      %53 = vector.load %arg7[%c0_47, %c0_48, %c0_49] : memref<1x2x1xf32, #tpu.memory_space<vmem>>, vector<1x2x1xf32>
      tpu.vector_store %arg7[%c0_47, %c0_48, %c0_49], %52 {strides = array<i32>} : memref<1x2x1xf32, #tpu.memory_space<vmem>>, vector<1x2x1xf32>,
    } else {
    }
    %c0 = arith.constant 0 : index
    %c0_1 = arith.constant 0 : index
    %c0_2 = arith.constant 0 : index
    %3 = vector.load %arg2[%c0, %c0_1, %c0_2] : memref<2x4x256xf32, #tpu.memory_space<vmem>>, vector<2x4x256xf32>
    %c0_3 = arith.constant 0 : index
    %c0_4 = arith.constant 0 : index
    %c0_5 = arith.constant 0 : index
    %4 = vector.load %arg3[%c0_3, %c0_4, %c0_5] : memref<2x4x256xf32, #tpu.memory_space<vmem>>, vector<2x4x256xf32>
    %5 = arith.mulf %3, %4 : vector<2x4x256xf32>
    %c0_6 = arith.constant 0 : index
    %c0_7 = arith.constant 0 : index
    %c0_8 = arith.constant 0 : index
    %6 = vector.load %arg4[%c0_6, %c0_7, %c0_8] : memref<1x2x4xf32, #tpu.memory_space<vmem>>, vector<1x2x4xf32>
    %cst = arith.constant dense<0.000000e+00> : vector<2x4xf32>
    %7 = vector.multi_reduction <add>, %5, %cst [2] : vector<2x4x256xf32> to vector<2x4xf32>
    %8 = vector.shape_cast %7 : vector<2x4xf32> to vector<1x2x4xf32>
    %9 = arith.addf %6, %8 : vector<1x2x4xf32>
    %c0_9 = arith.constant 0 : index
    %c0_10 = arith.constant 0 : index
    %c0_11 = arith.constant 0 : index
    %10 = vector.load %arg4[%c0_9, %c0_10, %c0_11] : memref<1x2x4xf32, #tpu.memory_space<vmem>>, vector<1x2x4xf32>
    tpu.vector_store %arg4[%c0_9, %c0_10, %c0_11], %9 {strides = array<i32>} : memref<1x2x4xf32, #tpu.memory_space<vmem>>, vector<1x2x4xf32>,
    %c0_12 = arith.constant 0 : index
    %c0_13 = arith.constant 0 : index
    %c0_14 = arith.constant 0 : index
    %11 = vector.load %arg5[%c0_12, %c0_13, %c0_14] : memref<1x2x4xf32, #tpu.memory_space<vmem>>, vector<1x2x4xf32>
    %cst_15 = arith.constant dense<0.000000e+00> : vector<2x4xf32>
    %12 = vector.multi_reduction <add>, %3, %cst_15 [2] : vector<2x4x256xf32> to vector<2x4xf32>
    %13 = vector.shape_cast %12 : vector<2x4xf32> to vector<1x2x4xf32>
    %14 = arith.addf %11, %13 : vector<1x2x4xf32>
    %c0_16 = arith.constant 0 : index
    %c0_17 = arith.constant 0 : index
    %c0_18 = arith.constant 0 : index
    %15 = vector.load %arg5[%c0_16, %c0_17, %c0_18] : memref<1x2x4xf32, #tpu.memory_space<vmem>>, vector<1x2x4xf32>
    tpu.vector_store %arg5[%c0_16, %c0_17, %c0_18], %14 {strides = array<i32>} : memref<1x2x4xf32, #tpu.memory_space<vmem>>, vector<1x2x4xf32>,
    %c0_19 = arith.constant 0 : index
    %c0_20 = arith.constant 0 : index
    %c0_21 = arith.constant 0 : index
    %16 = vector.load %arg6[%c0_19, %c0_20, %c0_21] : memref<1x2x4xf32, #tpu.memory_space<vmem>>, vector<1x2x4xf32>
    %cst_22 = arith.constant dense<0.000000e+00> : vector<2x4xf32>
    %17 = vector.multi_reduction <add>, %4, %cst_22 [2] : vector<2x4x256xf32> to vector<2x4xf32>
    %18 = vector.shape_cast %17 : vector<2x4xf32> to vector<1x2x4xf32>
    %19 = arith.addf %16, %18 : vector<1x2x4xf32>
    %c0_23 = arith.constant 0 : index
    %c0_24 = arith.constant 0 : index
    %c0_25 = arith.constant 0 : index
    %20 = vector.load %arg6[%c0_23, %c0_24, %c0_25] : memref<1x2x4xf32, #tpu.memory_space<vmem>>, vector<1x2x4xf32>
    tpu.vector_store %arg6[%c0_23, %c0_24, %c0_25], %19 {strides = array<i32>} : memref<1x2x4xf32, #tpu.memory_space<vmem>>, vector<1x2x4xf32>,
    %21 = tpu.iota {dimensions = array<i32: 1>} : vector<2x4x256xi32>
    %22 = arith.sitofp %21 : vector<2x4x256xi32> to vector<2x4x256xf32>
    %cst_26 = arith.constant dense<0xFF800000> : vector<2x256xf32>
    %23 = vector.multi_reduction <maximumf>, %4, %cst_26 [1] : vector<2x4x256xf32> to vector<2x256xf32>
    %24 = vector.shape_cast %23 : vector<2x256xf32> to vector<2x1x256xf32>
    %25 = vector.broadcast %24 : vector<2x1x256xf32> to vector<2x4x256xf32>
    %26 = arith.cmpf oge, %4, %25 : vector<2x4x256xf32>
    %cst_27 = arith.constant 4.000000e+00 : f32
    %27 = vector.broadcast %cst_27 : f32 to vector<2x4x256xf32>
    %28 = arith.select %26, %22, %27 : vector<2x4x256xi1>, vector<2x4x256xf32>
    %cst_28 = arith.constant dense<0x7F800000> : vector<2x256xf32>
    %29 = vector.multi_reduction <minimumf>, %28, %cst_28 [1] : vector<2x4x256xf32> to vector<2x256xf32>
    %30 = vector.shape_cast %29 : vector<2x256xf32> to vector<2x1x256xf32>
    %31 = vector.broadcast %30 : vector<2x1x256xf32> to vector<2x4x256xf32>
    %32 = arith.cmpf oeq, %22, %31 : vector<2x4x256xf32>
    %cst_29 = arith.constant 0.000000e+00 : f32
    %33 = vector.broadcast %cst_29 : f32 to vector<2x4x256xf32>
    %34 = arith.select %32, %3, %33 : vector<2x4x256xi1>, vector<2x4x256xf32>
    %cst_30 = arith.constant dense<0.000000e+00> : vector<2x256xf32>
    %35 = vector.multi_reduction <add>, %34, %cst_30 [1] : vector<2x4x256xf32> to vector<2x256xf32>
    %c2_i32 = arith.constant 2 : i32
    %36 = arith.muli %arg0, %c2_i32 : i32
    %37 = arith.addi %36, %arg1 : i32
    %c256_i32 = arith.constant 256 : i32
    %38 = arith.muli %37, %c256_i32 : i32
    %c256_i32_31 = arith.constant 256 : i32
    %39 = arith.addi %38, %c256_i32_31 : i32
    %c1024_i32 = arith.constant 1024 : i32
    %40 = arith.cmpi sgt, %39, %c1024_i32 : i32
    %true = arith.constant true
    %41 = arith.xori %40, %true : i1
    %42 = arith.extui %41 : i1 to i32
    %c0_i32_32 = arith.constant 0 : i32
    %43 = arith.cmpi ne, %42, %c0_i32_32 : i32
    scf.if %43 {
      %c0_34 = arith.constant 0 : index
      %c0_35 = arith.constant 0 : index
      %c0_36 = arith.constant 0 : index
      %46 = vector.load %arg7[%c0_34, %c0_35, %c0_36] : memref<1x2x1xf32, #tpu.memory_space<vmem>>, vector<1x2x1xf32>
      %cst_37 = arith.constant 9.99999993E-9 : f32
      %47 = vector.broadcast %cst_37 : f32 to vector<2x256xf32>
      %48 = arith.addf %35, %47 : vector<2x256xf32>
      %49 = math.log %48 : vector<2x256xf32>
      %cst_38 = arith.constant dense<0.000000e+00> : vector<2xf32>
      %50 = vector.multi_reduction <add>, %49, %cst_38 [1] : vector<2x256xf32> to vector<2xf32>
      %51 = vector.shape_cast %50 : vector<2xf32> to vector<2x1xf32>
      %52 = vector.shape_cast %51 : vector<2x1xf32> to vector<1x2x1xf32>
      %53 = arith.addf %46, %52 : vector<1x2x1xf32>
      %c0_39 = arith.constant 0 : index
      %c0_40 = arith.constant 0 : index
      %c0_41 = arith.constant 0 : index
      %54 = vector.load %arg7[%c0_39, %c0_40, %c0_41] : memref<1x2x1xf32, #tpu.memory_space<vmem>>, vector<1x2x1xf32>
      tpu.vector_store %arg7[%c0_39, %c0_40, %c0_41], %53 {strides = array<i32>} : memref<1x2x1xf32, #tpu.memory_space<vmem>>, vector<1x2x1xf32>,
    } else {
    }
    %44 = arith.extui %40 : i1 to i32
    %c0_i32_33 = arith.constant 0 : i32
    %45 = arith.cmpi ne, %44, %c0_i32_33 : i32
    scf.if %45 {
      %46 = tpu.iota {dimensions = array<i32: 1>} : vector<2x256xi32>
      %47 = vector.broadcast %38 : i32 to vector<2x256xi32>
      %48 = arith.addi %46, %47 : vector<2x256xi32>
      %c1024_i32_34 = arith.constant 1024 : i32
      %49 = vector.broadcast %c1024_i32_34 : i32 to vector<2x256xi32>
      %50 = arith.cmpi slt, %48, %49 : vector<2x256xi32>
      %cst_35 = arith.constant 9.99999993E-9 : f32
      %51 = vector.broadcast %cst_35 : f32 to vector<2x256xf32>
      %52 = arith.addf %35, %51 : vector<2x256xf32>
      %53 = math.log %52 : vector<2x256xf32>
      %cst_36 = arith.constant 0.000000e+00 : f32
      %54 = vector.broadcast %cst_36 : f32 to vector<2x256xf32>
      %55 = arith.select %50, %53, %54 : vector<2x256xi1>, vector<2x256xf32>
      %c0_37 = arith.constant 0 : index
      %c0_38 = arith.constant 0 : index
      %c0_39 = arith.constant 0 : index
      %56 = vector.load %arg7[%c0_37, %c0_38, %c0_39] : memref<1x2x1xf32, #tpu.memory_space<vmem>>, vector<1x2x1xf32>
      %cst_40 = arith.constant dense<0.000000e+00> : vector<2xf32>
      %57 = vector.multi_reduction <add>, %55, %cst_40 [1] : vector<2x256xf32> to vector<2xf32>
      %58 = vector.shape_cast %57 : vector<2xf32> to vector<2x1xf32>
      %59 = vector.shape_cast %58 : vector<2x1xf32> to vector<1x2x1xf32>
      %60 = arith.addf %56, %59 : vector<1x2x1xf32>
      %c0_41 = arith.constant 0 : index
      %c0_42 = arith.constant 0 : index
      %c0_43 = arith.constant 0 : index
      %61 = vector.load %arg7[%c0_41, %c0_42, %c0_43] : memref<1x2x1xf32, #tpu.memory_space<vmem>>, vector<1x2x1xf32>
      tpu.vector_store %arg7[%c0_41, %c0_42, %c0_43], %60 {strides = array<i32>} : memref<1x2x1xf32, #tpu.memory_space<vmem>>, vector<1x2x1xf32>,
    } else {
    }
    return
  }
  func.func @transform_0(%arg0: i32, %arg1: i32) -> (i32, i32, i32) {
    %c2_i32 = arith.constant 2 : i32
    %0 = arith.muli %arg0, %c2_i32 : i32
    %1 = arith.addi %0, %arg1 : i32
    %c0_i32 = arith.constant 0 : i32
    %c0_i32_0 = arith.constant 0 : i32
    %c0_i32_1 = arith.constant 0 : i32
    return %c0_i32, %c0_i32_0, %1 : i32, i32, i32
  }
  func.func @transform_1(%arg0: i32, %arg1: i32) -> (i32, i32, i32) {
    %c2_i32 = arith.constant 2 : i32
    %0 = arith.muli %arg0, %c2_i32 : i32
    %1 = arith.addi %0, %arg1 : i32
    %c0_i32 = arith.constant 0 : i32
    %c0_i32_0 = arith.constant 0 : i32
    %c0_i32_1 = arith.constant 0 : i32
    return %c0_i32, %c0_i32_0, %1 : i32, i32, i32
  }
  func.func @transform_2(%arg0: i32, %arg1: i32) -> (i32, i32, i32) {
    %c0_i32 = arith.constant 0 : i32
    %c0_i32_0 = arith.constant 0 : i32
    %c0_i32_1 = arith.constant 0 : i32
    return %arg0, %c0_i32, %c0_i32_0 : i32, i32, i32
  }
  func.func @transform_3(%arg0: i32, %arg1: i32) -> (i32, i32, i32) {
    %c0_i32 = arith.constant 0 : i32
    %c0_i32_0 = arith.constant 0 : i32
    %c0_i32_1 = arith.constant 0 : i32
    return %arg0, %c0_i32, %c0_i32_0 : i32, i32, i32
  }
  func.func @transform_4(%arg0: i32, %arg1: i32) -> (i32, i32, i32) {
    %c0_i32 = arith.constant 0 : i32
    %c0_i32_0 = arith.constant 0 : i32
    %c0_i32_1 = arith.constant 0 : i32
    return %arg0, %c0_i32, %c0_i32_0 : i32, i32, i32
  }
  func.func @transform_5(%arg0: i32, %arg1: i32) -> (i32, i32, i32) {
    %c0_i32 = arith.constant 0 : i32
    %c0_i32_0 = arith.constant 0 : i32
    %c0_i32_1 = arith.constant 0 : i32
    return %arg0, %c0_i32, %c0_i32_0 : i32, i32, i32
  }
}

</mosaic_0001>

<bundles_post_ra>
// kernel: tpu_custom_call.1
= control target key start
LH: loop header
LB: loop body
LE: loop exit
PB: predicated region body
PF: predicated region fallthrough
CT: control target
= control target key end

     0   :  { %s1779_s0 = inlined_call_operand.hbm [shape: f32[2,4,1024], index: 0, kind: input, shape index: {}]   ;;  %s1780_s1 = inlined_call_operand.hbm [shape: f32[2,4,1024], index: 1, kind: input, shape index: {}]   ;;  %s1781_s2 = inlined_call_operand.hbm [shape: f32[2,2,4], index: 2, kind: output, shape index: {0}]   ;;  %s1782_s3 = inlined_call_operand.hbm [shape: f32[2,2,4], index: 3, kind: output, shape index: {1}]   ;;  %s1783_s4 = inlined_call_operand.hbm [shape: f32[2,2,4], index: 4, kind: output, shape index: {2}]   ;;  %s1784_s5 = inlined_call_operand.vmem [shape: f32[2,2,1], index: 5, kind: output, shape index: {3}]  }
   0x1   :  { %1794 = sst [smem:[#allocation25_spill]] %s1779_s0 }
   0x2   :  { %1795 = sst [smem:[#allocation26_spill]] %s1783_s4 }
   0x3   :  { %11 = vsyncpa [#allocation3], 0 }
   0x4   :  { %13 = vsyncpa [#allocation3 + $0x1], 0 }
   0x5   :  { %14 = vsyncpa [#allocation6], 0 }
   0x6   :  { %16 = vsyncpa [#allocation6 + $0x1], 0 }
   0x7   :  { %17 = vsyncpa [#allocation4], 0 }
   0x8   :  { %19 = vsyncpa [#allocation4 + $0x1], 0 }
   0x9   :  { %20 = vsyncpa [#allocation9], 0 }
   0xa   :  { %22 = vsyncpa [#allocation9 + $0x1], 0  ;;  %s1407_s18 = smov 0   ;;  %s1409_s19 = smov 0  }
   0xb   :  { %s1411_s20 = smov 0   ;;  %s1413_s21 = smov 0  }
   0xc   :  { %s1415_s22 = smov 0   ;;  %s1417_s23 = smov 0  }
   0xd   :  { %s1419_s24 = smov 0   ;;  %s1421_s25 = smov 0  }
   0xe   :  { %s1423_s26 = smov 0   ;;  %s1425_s27 = smov 0  }
   0xf   :  { %s1427_s28 = smov 0  }
  0x10 LB: > { %1796 = sst [smem:[#allocation15_spill]] %s1330_s18  ;;  %s1461_s29 = sadd.s32 4294967295, %s1370_s28   ;;  %s1370_s28 = sphi %s1427_s28, %s28_s28   ;;  %s1366_s27 = sphi %s1425_s27, %s1824_s27   ;;  %s1362_s26 = sphi %s1423_s26, %s1823_s26   ;;  %s1358_s25 = sphi %s1421_s25, %s1822_s25   ;;  %s1354_s24 = sphi %s1419_s24, %s1821_s24   ;;  %s1350_s23 = sphi %s1417_s23, %s1820_s23   ;;  %s1346_s22 = sphi %s1415_s22, %s1828_s22   ;;  %s1342_s21 = sphi %s1413_s21, %s1827_s21   ;;  %s1338_s20 = sphi %s1411_s20, %s1818_s20   ;;  %s1334_s19 = sphi %s1409_s19, %s1826_s19   ;;  %s1330_s18 = sphi %s1407_s18, %s1825_s18  }
  0x11   : > { %1797 = sst [smem:[#allocation16_spill]] %s1338_s20  ;;  %s37_s6 = sadd.s32 1, %s1362_s26 }
  0x12   : > { %1798 = sst [smem:[#allocation17_spill]] %s1350_s23  ;;  %s40_s7 = sadd.s32 1, %s1366_s27 }
  0x13   : > { %1799 = sst [smem:[#allocation18_spill]] %s1362_s26  ;;  %p38_p0 = scmp.ge.s32.totalorder %s37_s6, 2 }
  0x14   : > { %1800 = sst [smem:[#allocation19_spill]] %s1366_s27  ;;  %s950_s8 = sshll.u32 %s1366_s27, 1 }
  0x15   : > { %s1468_s9 = sadd.s32 %s1362_s26, %s950_s8  ;;  %s51_s10 = sadd.s32 1, %s1350_s23 }
  0x16   : > { %s1830_s6 = smov (%p38_p0, %s37_s6), 0  ;;  %s1832_s7 = smov (!%p38_p0, %s40_s7), %s1366_s27 }
  0x17   : > { %1801 = sst [smem:[#allocation20_spill]] %s1830_s6  ;;  %p58_p1 = scmp.ne.s32.totalorder %s1350_s23, %s1346_s22 }
  0x18   : > { %p59_p2 = scmp.eq.s32.totalorder %s1370_s28, 0  ;;  %p42_p3 = scmp.ge.s32.totalorder %s1832_s7, 2 }
  0x19   : > { %p64_p4 = scmp.ne.s32.totalorder %s1346_s22, %s1342_s21  ;;  %p65_p6 = scmp.eq.s32.totalorder %s1461_s29, 0 }
  0x1a   : > { %p1478_p5 = por %p59_p2, %p58_p1  ;;  %s1834_s7 = smov (%p42_p3, %s1832_s7), 0 }
  0x1b   : > { %1803 = sst [smem:[#allocation21_spill]] %s1834_s7  ;;  %p1485_p7 = por %p65_p6, %p64_p4 }
  0x1c   : > { %s107_s13 = sadd.s32 1, %s1338_s20  ;;  %s951_s14 = sshll.u32 %s1834_s7, 1 }
  0x1d   : > { %s104_s15 = ssub.s32 %s1366_s27, %s1834_s7  ;;  %s47_s16 = sadd.s32 %s951_s14, %s1830_s6 }
  0x1e   : > { %p105_p8 = scmp.eq.s32.totalorder %s104_s15, 0  ;;  %s48_s17 = ssub.s32 %s1468_s9, %s47_s16 }
  0x1f   : > { %p117_p9 = scmp.ne.s32.totalorder %s1338_s20, %s1334_s19  ;;  %p49_p10 = scmp.eq.s32.totalorder %s48_s17, 0 }
  0x20   : > { %p118_p11 = scmp.eq.s32.totalorder %s1461_s29, 3  ;;  %p123_p13 = scmp.ne.s32.totalorder %s1334_s19, %s1330_s18 }
  0x21   : > { %s1499_s21 = scalar_select %p105_p8, %s1338_s20, %s107_s13  }
  0x22   : > { %s1502_s8 = scalar_select %p49_p10, %s1350_s23, %s51_s10  }
  0x23   : > { %1805 = sst [smem:[#allocation22_spill]] %s1499_s21  ;;  %p1504_p12 = por %p118_p11, %p117_p9 }
  0x24   : > { %1806 = sst [smem:[#allocation23_spill]] %s1502_s8  ;;  %s1808_s26 = sadd.s32 4294967294, %s1370_s28  }
  0x25   : > { %p124_p0 = scmp.eq.s32.totalorder %s1808_s26, 3  ;;  %p1013_p1 = scmp.lt.s32.totalorder %s1370_s28, 4 }
  0x26   : > { %s1514_s14 = sand.u32 1, %s1350_s23   ;;  %s984_s13 = sshll.u32 %s1468_s9, 3 }
  0x27   : > { %p1516_p2 = por %p124_p0, %p123_p13  ;;  %s956_s10 = sshll.u32 %s1514_s14, 4 }
  0x28   : > { %s1811_s0 = sld [smem:[#allocation25_spill]]  ;;  %s226_s27 = scalar_lea.vmem [#allocation2], %s956_s10 }
  0x29   : > { %s1809_s15 = scalar_select %p1516_p2, 1, 0 }
  0x2a   : > { %s236_s8 = sshll.u32 %s226_s27, 4  ;;  %p1527_p3 = pnand %p1013_p1, %p1478_p5  ;;  %s237_s8 = int_to_ptr.vmem [resolvable:$true] %s236_s8 }
  0x2b   : > { %1810 = sst [smem:[#allocation24_spill]] %s1809_s15  ;;  %p964_p4 = scmp.ge.s32.totalorder %s1370_s28, 1 }
  0x2c   : > { %s223_s23 = scalar_lea.sflag [#allocation3], %s1514_s14  ;;  %s1372_s9 = smov 512  }
  0x2d   : > { %s1373_s21 = smov 128   ;;  %s1374_s20 = smov 8  }
  0x2e   : > { %s233_s7 = scalar_lea.hbm %s1811_s0, %s984_s13  ;;  %p268_p6 = scmp.lt.s32.totalorder %s1370_s28, 5 }
  0x2f   : > { %s234_s6 = sshll.u32 %s233_s7, 4  ;;  %s257_s16 = scalar_lea.hbm %s1780_s1, %s984_s13  ;;  %s235_s6 = int_to_ptr.hbm [resolvable:$true] %s234_s6 }
  0x30   : > { %999 = dma.hbm_to_vmem [thread:$0]  (!%p1527_p3), %s235_s6, 256, %s237_s8, %s223_s23, %s1372_s9, %s1373_s21, %s1374_s20  }
  0x31   : > { %p269_p8 = pnand %p964_p4, %p268_p6  ;;  %s258_s11 = sshll.u32 %s257_s16, 4  ;;  %s259_s11 = int_to_ptr.hbm [resolvable:$true] %s258_s11 }
  0x32   : > { %s250_s17 = scalar_lea.vmem [#allocation5], %s956_s10  ;;  %s247_s15 = scalar_lea.sflag [#allocation6], %s1514_s14 }
  0x33   : > { %s260_s0 = sshll.u32 %s250_s17, 4  ;;  %272 = sbr.rel (%p269_p8) target bundleno = 558 (0x22e), region = 28  ;;  %s261_s0 = int_to_ptr.vmem [resolvable:$true] %s260_s0 }
  0x34   : > { %1002 = dma.hbm_to_vmem [thread:$0]  (!%p1527_p3), %s259_s11, 256, %s261_s0, %s247_s15, %s1372_s9, %s1373_s21, %s1374_s20  }
  0x35   : > { %s274_s18 = sand.u32 (!%p269_p8), 1, %s1346_s22  }
  0x36   : > { %s965_s4 = sshll.u32 (!%p269_p8), %s274_s18, 4  ;;  %s275_s23 = scalar_lea.sflag (!%p269_p8), [#allocation3], %s274_s18 }
  0x37   : > { %s278_s6 = scalar_lea.vmem (!%p269_p8), [#allocation2], %s965_s4 }
  0x38   : > { %1313 = dma.done.wait (%p1485_p7), %s275_s23, 256  }
  0x39   : > { %1315 = vsyncadd (%p1485_p7), %s275_s23, 4294967040  ;;  %s285_s8 = scalar_lea.sflag [#allocation6], %s274_s18  ;;  %s288_s10 = scalar_lea.vmem [#allocation5], %s965_s4 }
  0x3a   : > { %1317 = dma.done.wait (%p1485_p7), %s285_s8, 256  }
  0x3b   : > { %1319 = vsyncadd (%p1485_p7), %s285_s8, 4294967040  ;;  %s312_s0 = sand.u32 1, %s1334_s19   ;;  %p341_p5 = scmp.lt.s32.totalorder %s1358_s25, 1 }
  0x3c   : > { %s967_s20 = sshll.u32 %s312_s0, 1  ;;  %p971_p7 = scmp.ne.s32.totalorder %s1354_s24, 0 }
  0x3d   : > { %s342_s21 = scalar_select %p341_p5, %s1358_s25, 1 }
  0x3e   : > { %s1561_s4 = scalar_lea.vmem [#allocation7], %s967_s20  ;;  %s1563_s26 = scalar_lea.vmem [#allocation8], %s967_s20 }
  0x3f   : > { %s970_s14 = sshll.u32 %s342_s21, 1  ;;  %s1565_s12 = scalar_lea.vmem [#allocation10], %s967_s20 }
  0x40   : > { %s1559_s18 = scalar_lea.vmem %s1784_s5, %s970_s14  ;;  %348 = sbr.rel (%p971_p7) target bundleno = 74 (0x4a), region = 40 }
  0x45   : > { %vm349_vm0 = vcmask 25600   ;;  %v1375_v0 = vmov 0.0   ;;  %vm353_vm1 = vcmask 1024  }
  0x46   : > { %350 = vst.msk [vmem:[%s1561_s4] sm:$0x3] %vm349_vm0, %v1375_v0 }
  0x47   : > { %351 = vst.msk [vmem:[%s1563_s26] sm:$0x3] %vm349_vm0, %v1375_v0 }
  0x48   : > { %352 = vst.msk [vmem:[%s1565_s12] sm:$0x3] %vm349_vm0, %v1375_v0 }
  0x49   : > { %354 = vst.msk [vmem:[%s1559_s18] sm:$0x3] %vm353_vm1, %v1375_v0 }
  0x4a PF: > { %v1572_v1 = vld [vmem:[%s278_s6] sm:$0xff]  ;;  %v1576_v3 = vld [vmem:[%s278_s6 + $0x8] sm:$0xff]  ;;  %vm375_vm2 = vcmask 1043456   ;;  %s1601_s9 = sshll.u32 %s1358_s25, 1  ;;  %v388_v41 = vlaneseq  ;;  %v1376_v57 = vmov 839922192  }
  0x4b   : > { %v1574_v2 = vld [vmem:[%s288_s10] sm:$0xff]  ;;  %v1580_v5 = vld [vmem:[%s288_s10 + $0x8] sm:$0xff]  ;;  %s613_s7 = sadd.s32 %s1354_s24, %s1601_s9  ;;  %v518_v58 = vunpack.c.l.s4 %v1376_v57  ;;  %vm392_vm9 = vcmask 1041409   ;;  %vm396_vm10 = vcmask 25600  }
  0x4c   : > { %v359_v4 = vmul.f32 %v1574_v2, %v1572_v1  ;;  %v360_v6 = vmul.f32 %v1580_v5, %v1576_v3  ;;  %s1607_s27 = sshll.u32 %s613_s7, 8  ;;  %v463_v54 = vshrl.u32 %v388_v41, 7 }
  0x4d   : > { %s615_s16 = sadd.s32 256, %s1607_s27 }
  0x4e   : > { %364 = vst [vmem:[#allocation1] ss:$2 sm:$0xff] %v359_v4  ;;  %v1615_v4 = vcvt.s32.f32 %v463_v54  ;;  %p974_p9 = scmp.gt.s32.totalorder %s615_s16, 1024 }
  0x4f   : > { %368 = vst [vmem:[#allocation1 + $0x10] ss:$2 sm:$0xff] %v360_v6 }
  0x55   : > { %v365_v7 = vld.sshfl [vmem:[#allocation1] sm:$0xff pattern:$0x75316420]  ;;  %v366_v8 = vld.sshfl [vmem:[#allocation1 + $0x8] sm:$0xff pattern:$0x75316420] }
  0x56   : > { %401 = vst [vmem:[#allocation1] ss:$2 sm:$0xff] %v1572_v1  ;;  %v376_v9 = vsel %vm375_vm2, %v365_v7, 0.0  ;;  %v377_v10 = vsel %vm375_vm2, %v366_v8, 0.0  ;;  %v519_v8 = vunpack.c.0.s8 %v518_v58 }
  0x57   : > { %v378_v11 = vadd.f32 %v377_v10, %v376_v9  ;;  %v369_v12 = vld.sshfl [vmem:[#allocation1 + $0x10] sm:$0xff pattern:$0x75316420]  ;;  %v370_v13 = vld.sshfl [vmem:[#allocation1 + $0x18] sm:$0xff pattern:$0x75316420] }
  0x58   : > { %405 = vst [vmem:[#allocation1 + $0x10] ss:$2 sm:$0xff] %v1576_v3  ;;  %v381_v14 = vsel %vm375_vm2, %v369_v12, 0.0  ;;  %v382_v15 = vsel %vm375_vm2, %v370_v13, 0.0 }
  0x59   : > { %379 = vadd.xlane.f32.xlu0 %v378_v11  ;;  %v383_v18 = vadd.f32 %v382_v15, %v381_v14 }
  0x5d   : > { %v402_v16 = vld.sshfl [vmem:[#allocation1] sm:$0xff pattern:$0x75316420]  ;;  %v403_v17 = vld.sshfl [vmem:[#allocation1 + $0x8] sm:$0xff pattern:$0x75316420] }
  0x5e   : > { %v412_v19 = vsel %vm375_vm2, %v402_v16, 0.0  ;;  %v413_v20 = vsel %vm375_vm2, %v403_v17, 0.0  ;;  %433 = vst [vmem:[#allocation1] ss:$2 sm:$0xff] %v1574_v2  ;;  %v520_v16 = vperm.slane %v1615_v4, %v519_v8 }
  0x5f   : > { %v414_v21 = vadd.f32 %v413_v20, %v412_v19  ;;  %v406_v22 = vld.sshfl [vmem:[#allocation1 + $0x10] sm:$0xff pattern:$0x75316420]  ;;  %v407_v23 = vld.sshfl [vmem:[#allocation1 + $0x18] sm:$0xff pattern:$0x75316420] }
  0x60   : > { %437 = vst [vmem:[#allocation1 + $0x10] ss:$2 sm:$0xff] %v1580_v5  ;;  %v417_v24 = vsel %vm375_vm2, %v406_v22, 0.0  ;;  %v418_v25 = vsel %vm375_vm2, %v407_v23, 0.0 }
  0x61   : > { %415 = vadd.xlane.f32.xlu1 %v414_v21  ;;  %384 = vadd.xlane.f32.xlu0 %v383_v18  ;;  %v419_v28 = vadd.f32 %v418_v25, %v417_v24 }
  0x65   : > { %v434_v26 = vld.sshfl [vmem:[#allocation1] sm:$0xff pattern:$0x75316420]  ;;  %v435_v27 = vld.sshfl [vmem:[#allocation1 + $0x8] sm:$0xff pattern:$0x75316420] }
  0x66   : > { %v444_v29 = vsel %vm375_vm2, %v434_v26, 0.0  ;;  %v445_v30 = vsel %vm375_vm2, %v435_v27, 0.0  ;;  %465 = vst [vmem:[#allocation1] ss:$2 sm:$0xff] %v1574_v2 }
  0x67   : > { %v446_v31 = vadd.f32 %v445_v30, %v444_v29  ;;  %v438_v32 = vld.sshfl [vmem:[#allocation1 + $0x10] sm:$0xff pattern:$0x75316420]  ;;  %v439_v33 = vld.sshfl [vmem:[#allocation1 + $0x18] sm:$0xff pattern:$0x75316420] }
  0x68   : > { %469 = vst [vmem:[#allocation1 + $0x10] ss:$2 sm:$0xff] %v1580_v5  ;;  %v449_v34 = vsel %vm375_vm2, %v438_v32, 0.0  ;;  %v450_v35 = vsel %vm375_vm2, %v439_v33, 0.0 }
  0x69   : > { %447 = vadd.xlane.f32.xlu2 %v446_v31  ;;  %420 = vadd.xlane.f32.xlu1 %v419_v28  ;;  %v451_v36 = vadd.f32 %v450_v35, %v449_v34 }
  0x6d   : > { %v466_v37 = vld.sshfl [vmem:[#allocation1] sm:$0xff pattern:$0x75316420]  ;;  %v467_v38 = vld.sshfl [vmem:[#allocation1 + $0x8] sm:$0xff pattern:$0x75316420] }
  0x6e   : > { %v476_v39 = vsel %vm375_vm2, %v466_v37, -inf  ;;  %v483_v40 = vsel %vm375_vm2, %v467_v38, -inf }
  0x6f   : > { %v470_v42 = vld.sshfl [vmem:[#allocation1 + $0x10] sm:$0xff pattern:$0x75316420]  ;;  %v471_v43 = vld.sshfl [vmem:[#allocation1 + $0x18] sm:$0xff pattern:$0x75316420] }
  0x70   : > { %v477_v44 = vrot.slane %v476_v39, 4  ;;  %v484_v45 = vrot.slane %v483_v40, 4  ;;  %v490_v46 = vsel %vm375_vm2, %v470_v42, -inf  ;;  %v497_v47 = vsel %vm375_vm2, %v471_v43, -inf }
  0x71   : > { %452 = vadd.xlane.f32.xlu2 %v451_v36  ;;  %v491_v48 = vrot.slane %v490_v46, 4  ;;  %v498_v49 = vrot.slane %v497_v47, 4 }
  0x72   : > { %v478_v50 = vmax.f32 %v476_v39, %v477_v44  ;;  %v485_v51 = vmax.f32 %v483_v40, %v484_v45 }
  0x73   : > { %v492_v52 = vmax.f32 %v490_v46, %v491_v48  ;;  %v499_v53 = vmax.f32 %v497_v47, %v498_v49 }
  0x74   : > { %v479_v55 = vrot.slane %v478_v50, 2  ;;  %v486_v56 = vrot.slane %v485_v51, 2 }
  0x75   : > { %v493_v59 = vrot.slane %v492_v52, 2  ;;  %v500_v60 = vrot.slane %v499_v53, 2 }
  0x76   : > { %v480_v61 = vmax.f32 %v478_v50, %v479_v55  ;;  %v487_v62 = vmax.f32 %v485_v51, %v486_v56 }
  0x77   : > { %v494_v63 = vmax.f32 %v492_v52, %v493_v59  ;;  %v501_v0 = vmax.f32 %v499_v53, %v500_v60 }
  0x78   : > { %v481_v6 = vrot.slane %v480_v61, 1  ;;  %v488_v7 = vrot.slane %v487_v62, 1 }
  0x79   : > { %v495_v9 = vrot.slane %v494_v63, 1  ;;  %v502_v10 = vrot.slane %v501_v0, 1 }
  0x7a   : > { %v482_v11 = vmax.f32 %v480_v61, %v481_v6  ;;  %v489_v12 = vmax.f32 %v487_v62, %v488_v7 }
  0x7b   : > { %v496_v13 = vmax.f32 %v494_v63, %v495_v9  ;;  %v503_v14 = vmax.f32 %v501_v0, %v502_v10 }
  0x7c   : > { %v508_v15 = vrot.slane %v489_v12, 4 }
  0x7d   : > { %v509_v17 = vrot.slane %v503_v14, 4 }
  0x7e   : > { %v510_v18 = vsel %vm375_vm2, %v482_v11, %v508_v15 }
  0x7f   : > { %v511_v19 = vsel %vm375_vm2, %v496_v13, %v509_v17  ;;  %vm514_vm3 = vcmp.ge.f32.partialorder %v1574_v2, %v510_v18 }
  0x80   : > { %vm515_vm4 = vcmp.ge.f32.partialorder %v1580_v5, %v511_v19  ;;  %v522_v20 = vsel %vm514_vm3, %v520_v16, 4.0 }
  0x81   : > { %v523_v21 = vsel %vm515_vm4, %v520_v16, 4.0  ;;  %526 = vst [vmem:[#allocation1] ss:$2 sm:$0xff] %v522_v20 }
  0x82   : > { %530 = vst [vmem:[#allocation1 + $0x10] ss:$2 sm:$0xff] %v523_v21 }
  0x88   : > { %v527_v22 = vld.sshfl [vmem:[#allocation1] sm:$0xff pattern:$0x75316420]  ;;  %v528_v23 = vld.sshfl [vmem:[#allocation1 + $0x8] sm:$0xff pattern:$0x75316420] }
  0x89   : > { %v531_v24 = vld.sshfl [vmem:[#allocation1 + $0x10] sm:$0xff pattern:$0x75316420]  ;;  %v532_v25 = vld.sshfl [vmem:[#allocation1 + $0x18] sm:$0xff pattern:$0x75316420] }
  0x8a   : > { %v537_v26 = vsel %vm375_vm2, %v527_v22, inf  ;;  %v544_v27 = vsel %vm375_vm2, %v528_v23, inf  ;;  %v551_v28 = vsel %vm375_vm2, %v531_v24, inf  ;;  %v558_v29 = vsel %vm375_vm2, %v532_v25, inf  ;;  %569 = vst [vmem:[#allocation1] ss:$2 sm:$0xff] %v1572_v1 }
  0x8b   : > { %v538_v2 = vrot.slane %v537_v26, 4  ;;  %v545_v5 = vrot.slane %v544_v27, 4  ;;  %v552_v30 = vrot.slane %v551_v28, 4  ;;  %v559_v31 = vrot.slane %v558_v29, 4  ;;  %573 = vst [vmem:[#allocation1 + $0x10] ss:$2 sm:$0xff] %v1576_v3 }
  0x8d   : > { %v539_v32 = vmin.f32 %v537_v26, %v538_v2  ;;  %v546_v33 = vmin.f32 %v544_v27, %v545_v5  ;;  %v553_v34 = vmin.f32 %v551_v28, %v552_v30  ;;  %v560_v35 = vmin.f32 %v558_v29, %v559_v31  ;;  %v361_v30 = vld [vmem:[%s1561_s4] sm:$0x3] }
  0x8e   : > { %v1645_v28 = vand.u32 127, %v388_v41 }
  0x8f   : > { %v540_v36 = vrot.slane %v539_v32, 2  ;;  %v547_v37 = vrot.slane %v546_v33, 2  ;;  %v554_v38 = vrot.slane %v553_v34, 2  ;;  %v561_v39 = vrot.slane %v560_v35, 2 }
  0x91   : > { %v541_v40 = vmin.f32 %v539_v32, %v540_v36  ;;  %v548_v42 = vmin.f32 %v546_v33, %v547_v37  ;;  %v555_v43 = vmin.f32 %v553_v34, %v554_v38  ;;  %v562_v44 = vmin.f32 %v560_v35, %v561_v39  ;;  %v570_v48 = vld.sshfl [vmem:[#allocation1] sm:$0xff pattern:$0x75316420]  ;;  %v571_v49 = vld.sshfl [vmem:[#allocation1 + $0x8] sm:$0xff pattern:$0x75316420] }
  0x92   : > { %v574_v53 = vld.sshfl [vmem:[#allocation1 + $0x10] sm:$0xff pattern:$0x75316420]  ;;  %v575_v54 = vld.sshfl [vmem:[#allocation1 + $0x18] sm:$0xff pattern:$0x75316420] }
  0x93   : > { %v542_v45 = vrot.slane %v541_v40, 1  ;;  %v549_v1 = vrot.slane %v548_v42, 1  ;;  %v556_v46 = vrot.slane %v555_v43, 1  ;;  %v563_v47 = vrot.slane %v562_v44, 1  ;;  %v398_v36 = vld [vmem:[%s1563_s26] sm:$0x3] }
  0x95   : > { %v543_v50 = vmin.f32 %v541_v40, %v542_v45  ;;  %v550_v3 = vmin.f32 %v548_v42, %v549_v1  ;;  %v557_v51 = vmin.f32 %v555_v43, %v556_v46  ;;  %v564_v52 = vmin.f32 %v562_v44, %v563_v47  ;;  %v430_v43 = vld [vmem:[%s1565_s12] sm:$0x3] }
  0x97   : > { %vm565_vm5 = vcmp.eq.f32.partialorder %v1615_v4, %v543_v50  ;;  %vm566_vm6 = vcmp.eq.f32.partialorder %v1615_v4, %v550_v3  ;;  %vm567_vm7 = vcmp.eq.f32.partialorder %v1615_v4, %v557_v51  ;;  %vm568_vm8 = vcmp.eq.f32.partialorder %v1615_v4, %v564_v52 }
  0x98   : > { %v580_v55 = vsel %vm565_vm5, %v570_v48, 0.0  ;;  %v581_v56 = vsel %vm566_vm6, %v571_v49, 0.0  ;;  %v582_v57 = vsel %vm567_vm7, %v574_v53, 0.0  ;;  %v583_v58 = vsel %vm568_vm8, %v575_v54, 0.0 }
  0x99   : > { %v584_v59 = vsel %vm375_vm2, %v580_v55, 0.0  ;;  %v591_v60 = vsel %vm375_vm2, %v581_v56, 0.0  ;;  %v598_v61 = vsel %vm375_vm2, %v582_v57, 0.0  ;;  %v605_v62 = vsel %vm375_vm2, %v583_v58, 0.0 }
  0x9a   : > { %v585_v63 = vrot.slane %v584_v59, 4  ;;  %v592_v0 = vrot.slane %v591_v60, 4  ;;  %v599_v6 = vrot.slane %v598_v61, 4  ;;  %v606_v7 = vrot.slane %v605_v62, 4 }
  0x9c   : > { %v586_v8 = vadd.f32 %v585_v63, %v584_v59  ;;  %v593_v9 = vadd.f32 %v592_v0, %v591_v60  ;;  %v600_v10 = vadd.f32 %v599_v6, %v598_v61  ;;  %v607_v4 = vadd.f32 %v606_v7, %v605_v62 }
  0x9e   : > { %v587_v11 = vrot.slane %v586_v8, 2  ;;  %v594_v12 = vrot.slane %v593_v9, 2  ;;  %v601_v13 = vrot.slane %v600_v10, 2  ;;  %v608_v14 = vrot.slane %v607_v4, 2 }
  0xa0   : > { %v588_v15 = vadd.f32 %v587_v11, %v586_v8  ;;  %v595_v16 = vadd.f32 %v594_v12, %v593_v9  ;;  %v602_v17 = vadd.f32 %v601_v13, %v600_v10  ;;  %v609_v18 = vadd.f32 %v608_v14, %v607_v4 }
  0xa2   : > { %v589_v19 = vrot.slane %v588_v15, 1  ;;  %v596_v20 = vrot.slane %v595_v16, 1  ;;  %v603_v21 = vrot.slane %v602_v17, 1  ;;  %v610_v22 = vrot.slane %v609_v18, 1 }
  0xa4   : > { %v1636_v23 = vadd.f32 %v589_v19, %v588_v15  ;;  %v1638_v24 = vadd.f32 %v596_v20, %v595_v16  ;;  %v1640_v25 = vadd.f32 %v603_v21, %v602_v17  ;;  %v1642_v26 = vadd.f32 %v610_v22, %v609_v18 }
  0xcc   : > { %v380_v27 = vpop.xlane.xlu0 %379 }
  0xcd   : > { %v390_v29 = vperm.slane %v380_v27, %v1645_v28 }
  0xd4   : > { %v416_v2 = vpop.xlane.xlu1 %415  ;;  %v385_v5 = vpop.xlane.xlu0 %384 }
  0xd5   : > { %v391_v31 = vperm.slane %v385_v5, %v1645_v28  ;;  %v424_v41 = vperm.slane %v416_v2, %v1645_v28 }
  0xd7   : > { %v393_v32 = vsel %vm392_vm9, %v391_v31, %v390_v29 }
  0xd8   : > { %v395_v33 = vadd.f32 %v393_v32, %v361_v30 }
  0xda   : > { %397 = vst.msk [vmem:[%s1561_s4] sm:$0x3] %vm396_vm10, %v395_v33 }
  0xdc   : > { %v448_v34 = vpop.xlane.xlu2 %447  ;;  %v421_v35 = vpop.xlane.xlu1 %420 }
  0xdd   : > { %v425_v37 = vperm.slane %v421_v35, %v1645_v28  ;;  %v456_v42 = vperm.slane %v448_v34, %v1645_v28 }
  0xdf   : > { %v426_v38 = vsel %vm392_vm9, %v425_v37, %v424_v41 }
  0xe0   : > { %v428_v39 = vadd.f32 %v426_v38, %v398_v36 }
  0xe2   : > { %429 = vst.msk [vmem:[%s1563_s26] sm:$0x3] %vm396_vm10, %v428_v39 }
  0xe4   : > { %v453_v40 = vpop.xlane.xlu2 %452 }
  0xe5   : > { %v457_v44 = vperm.slane %v453_v40, %v1645_v28 }
  0xe6   : > { %620 = sbr.rel (%p974_p9) target bundleno = 372 (0x174), region = 44 }
  0xe7   : > { %v458_v45 = vsel %vm392_vm9, %v457_v44, %v456_v42 }
  0xe8   : > { %v460_v1 = vadd.f32 %v458_v45, %v430_v43 }
  0xea   : > { %461 = vst.msk [vmem:[%s1565_s12] sm:$0x3] %vm396_vm10, %v460_v1 }
  0xeb   : > { %v622_v46 = vadd.f32 1e-08, %v1636_v23  ;;  %v623_v47 = vadd.f32 1e-08, %v1638_v24  ;;  %v624_v48 = vadd.f32 1e-08, %v1640_v25 }
  0xec   : > { %v625_v49 = vadd.f32 1e-08, %v1642_v26  ;;  %vm642_vm11 = vcmask 1041408   ;;  %v621_v62 = vld [vmem:[%s1559_s18] sm:$0x3]  ;;  %vm649_vm12 = vcmask 1024  }
  0xed   : > { %1108 = vlog2.f32 %v622_v46 }
  0xee   : > { %1110 = vlog2.f32 %v623_v47 }
  0xef   : > { %1112 = vlog2.f32 %v624_v48 }
  0xf0   : > { %1114 = vlog2.f32 %v625_v49 }
  0xf3   : > { %v1109_v50 = vpop.eup %1108 }
  0xf4   : > { %v1111_v3 = vpop.eup %1110  ;;  %v627_v51 = vmul.f32 0.6931472, %v1109_v50 }
  0xf5   : > { %v1113_v52 = vpop.eup %1112  ;;  %v629_v53 = vmul.f32 0.6931472, %v1111_v3 }
  0xf6   : > { %v1115_v54 = vpop.eup %1114  ;;  %v631_v55 = vmul.f32 0.6931472, %v1113_v52 }
  0xf7   : > { %v633_v56 = vmul.f32 0.6931472, %v1115_v54 }
  0xf8   : > { %v638_v57 = vsel %vm392_vm9, %v631_v55, %v627_v51 }
  0xf9   : > { %v639_v58 = vsel %vm392_vm9, %v633_v56, %v629_v53  ;;  %v643_v59 = vsel %vm642_vm11, %v638_v57, 0.0 }
  0xfa   : > { %v644_v60 = vsel %vm642_vm11, %v639_v58, 0.0 }
  0xfb   : > { %v645_v61 = vadd.f32 %v644_v60, %v643_v59 }
  0xfd   : > { %646 = vadd.xlane.f32.xlu0 %v645_v61 }
 0x170   : > { %v647_v63 = vpop.xlane.xlu0 %646 }
 0x171   : > { %v648_v0 = vadd.f32 %v647_v63, %v621_v62 }
 0x173   : > { %650 = vst.msk [vmem:[%s1559_s18] sm:$0x3] %vm649_vm12, %v648_v0 }
 0x174 PF: > { %p975_p10 = scmp.le.s32.totalorder %s615_s16, 1024 }
 0x176   : > { %653 = sbr.rel (%p975_p10) target bundleno = 517 (0x205), region = 48 }
 0x17b   : > { %v660_v6 = vadd.f32 1e-08, %v1636_v23  ;;  %v661_v7 = vadd.f32 1e-08, %v1638_v24  ;;  %v662_v8 = vadd.f32 1e-08, %v1640_v25  ;;  %v655_v4 = vstv %s1607_s27 }
 0x17c   : > { %v663_v9 = vadd.f32 1e-08, %v1642_v26  ;;  %v654_v10 = vadd.s32 128, %v1645_v28  ;;  %v656_v11 = vadd.s32 %v655_v4, %v1645_v28  ;;  %vm683_vm15 = vcmask 1041408   ;;  %v682_v28 = vld [vmem:[%s1559_s18] sm:$0x3] }
 0x17d   : > { %1116 = vlog2.f32 %v660_v6  ;;  %vm690_vm0 = vcmask 1024  }
 0x17e   : > { %1118 = vlog2.f32 %v661_v7  ;;  %v657_v13 = vadd.s32 %v655_v4, %v654_v10  ;;  %vm658_vm13 = vcmp.lt.s32.totalorder %v656_v11, 1024 }
 0x17f   : > { %1120 = vlog2.f32 %v662_v8 }
 0x180   : > { %1122 = vlog2.f32 %v663_v9  ;;  %vm659_vm14 = vcmp.lt.s32.totalorder %v657_v13, 1024 }
 0x183   : > { %v1117_v12 = vpop.eup %1116 }
 0x184   : > { %v1119_v14 = vpop.eup %1118  ;;  %v665_v15 = vmul.f32 0.6931472, %v1117_v12 }
 0x185   : > { %v1121_v16 = vpop.eup %1120  ;;  %v667_v17 = vmul.f32 0.6931472, %v1119_v14 }
 0x186   : > { %v1123_v18 = vpop.eup %1122  ;;  %v669_v19 = vmul.f32 0.6931472, %v1121_v16 }
 0x187   : > { %v671_v20 = vmul.f32 0.6931472, %v1123_v18 }
 0x188   : > { %v676_v21 = vsel %vm392_vm9, %v669_v19, %v665_v15 }
 0x189   : > { %v677_v22 = vsel %vm392_vm9, %v671_v20, %v667_v17  ;;  %v680_v23 = vsel %vm658_vm13, %v676_v21, 0.0 }
 0x18a   : > { %v681_v24 = vsel %vm659_vm14, %v677_v22, 0.0  ;;  %v684_v25 = vsel %vm683_vm15, %v680_v23, 0.0 }
 0x18b   : > { %v685_v26 = vsel %vm683_vm15, %v681_v24, 0.0 }
 0x18c   : > { %v686_v27 = vadd.f32 %v685_v26, %v684_v25 }
 0x18e   : > { %687 = vadd.xlane.f32.xlu0 %v686_v27 }
 0x201   : > { %v688_v29 = vpop.xlane.xlu0 %687 }
 0x202   : > { %v689_v2 = vadd.f32 %v688_v29, %v682_v28 }
 0x204   : > { %691 = vst.msk [vmem:[%s1559_s18] sm:$0x3] %vm690_vm0, %v689_v2 }
 0x205 PF: > { %s697_s24 = sand.u32 1, %s1461_s29   ;;  %s731_s17 = scalar_lea.hbm %s1782_s3, %s1601_s9 }
 0x206   : > { %s733_s23 = sshll.u32 %s1563_s26, 4  ;;  %s735_s6 = sshll.u32 %s731_s17, 4  ;;  %s734_s23 = int_to_ptr.vmem [resolvable:$true] %s733_s23  ;;  %s736_s6 = int_to_ptr.hbm [resolvable:$true] %s735_s6 }
 0x207   : > { %s1694_s8 = scalar_lea.sflag [#allocation9], %s697_s24  ;;  %s1198_s10 = sshra.s32 %s736_s6, 4  ;;  %s1199_s10 = int_to_ptr.hbm [resolvable:$true] %s1198_s10 }
 0x208   : > { %s1200_s20 = scalar_lea.hbm %s1199_s10, 2  ;;  %s1204_s29 = scalar_lea.hbm %s1782_s3, 4 }
 0x209   : > { %p1201_p11 = scmp.ne.s32.totalorder %s1199_s10, %s1200_s20  ;;  %p1205_p1 = scmp.lt.s32.totalorder %s1199_s10, %s1782_s3 }
 0x20a   : > { %p1206_p3 = scmp.lt.s32.totalorder %s1204_s29, %s1200_s20 }
 0x20b   : > { %p1202_p13 = pnand %p1201_p11, %p1504_p12 }
 0x20c   : > { %p1207_p4 = por %p1206_p3, %p1205_p1 }
 0x20d   : > { %p1203_p0 = pneg %p1202_p13 }
 0x20f   : > { %p1208_p6 = pnand %p1207_p4, %p1203_p0 }
 0x211   : > { %1211 = shalt.err (!%p1208_p6)
}
 0x212   : > { %991 = dma.vmem_to_hbm [thread:$0]  (%p1504_p12), %s734_s23, 32, %s736_s6, %s1694_s8  }
 0x213   : > { %s717_s7 = scalar_lea.hbm %s1781_s2, %s1601_s9  ;;  %s719_s27 = sshll.u32 %s1561_s4, 4  ;;  %s720_s27 = int_to_ptr.vmem [resolvable:$true] %s719_s27 }
 0x214   : > { %s721_s16 = sshll.u32 %s717_s7, 4  ;;  %s1813_s11 = sld [smem:[#allocation26_spill]]  ;;  %s722_s16 = int_to_ptr.hbm [resolvable:$true] %s721_s16 }
 0x215   : > { %s693_s10 = scalar_lea.sflag [#allocation4], %s312_s0  ;;  %s1226_s20 = sshra.s32 %s722_s16, 4  ;;  %s1227_s20 = int_to_ptr.hbm [resolvable:$true] %s1226_s20 }
 0x216   : > { %s1228_s21 = scalar_lea.hbm %s1227_s20, 2  ;;  %s1232_s4 = scalar_lea.hbm %s1781_s2, 4 }
 0x217   : > { %p1229_p8 = scmp.ne.s32.totalorder %s1227_s20, %s1228_s21  ;;  %p1233_p9 = scmp.lt.s32.totalorder %s1227_s20, %s1781_s2 }
 0x218   : > { %p1234_p10 = scmp.lt.s32.totalorder %s1232_s4, %s1228_s21 }
 0x219   : > { %p1230_p5 = pnand %p1229_p8, %p1504_p12 }
 0x21a   : > { %s745_s17 = scalar_lea.hbm %s1813_s11, %s1601_s9  ;;  %p1235_p11 = por %p1234_p10, %p1233_p9 }
 0x21b   : > { %p1231_p7 = pneg %p1230_p5 }
 0x21d   : > { %p1236_p13 = pnand %p1235_p11, %p1231_p7 }
 0x21f   : > { %1239 = shalt.err (!%p1236_p13)
}
 0x220   : > { %990 = dma.vmem_to_hbm [thread:$0]  (%p1504_p12), %s720_s27, 32, %s722_s16, %s693_s10  }
 0x221   : > { %s747_s0 = sshll.u32 %s1565_s12, 4  ;;  %s749_s9 = sshll.u32 %s745_s17, 4  ;;  %s748_s0 = int_to_ptr.vmem [resolvable:$true] %s747_s0  ;;  %s750_s9 = int_to_ptr.hbm [resolvable:$true] %s749_s9 }
 0x222   : > { %s1254_s15 = sshra.s32 %s750_s9, 4  ;;  %s1260_s7 = scalar_lea.hbm %s1813_s11, 4  ;;  %s1255_s15 = int_to_ptr.hbm [resolvable:$true] %s1254_s15 }
 0x223   : > { %s1256_s13 = scalar_lea.hbm %s1255_s15, 2  ;;  %p1261_p4 = scmp.lt.s32.totalorder %s1255_s15, %s1813_s11 }
 0x224   : > { %p1257_p0 = scmp.ne.s32.totalorder %s1255_s15, %s1256_s13  ;;  %p1262_p6 = scmp.lt.s32.totalorder %s1260_s7, %s1256_s13 }
 0x226   : > { %p1258_p1 = pnand %p1257_p0, %p1504_p12  ;;  %p1263_p8 = por %p1262_p6, %p1261_p4 }
 0x228   : > { %p1259_p3 = pneg %p1258_p1 }
 0x22a   : > { %p1264_p5 = pnand %p1263_p8, %p1259_p3 }
 0x22c   : > { %1267 = shalt.err (!%p1264_p5)
}
 0x22d   : > { %992 = dma.vmem_to_hbm [thread:$0]  (%p1504_p12), %s748_s0, 32, %s750_s9, %s1694_s8  }
 0x22e PF: > { %s1814_s12 = sld [smem:[#allocation15_spill]]  ;;  %p1014_p7 = scmp.ge.s32.totalorder %s1370_s28, 2 }
 0x230   : > { %p1004_p9 = pnand %p1014_p7, %p1516_p2 }
 0x232   : > { %p1005_p10 = pneg %p1004_p9 }
 0x234   : > { %s764_s16 = sand.u32 1, %s1814_s12  }
 0x235   : > { %s765_s17 = scalar_lea.sflag [#allocation4], %s764_s16 }
 0x236   : > { %1321 = dma.done.wait (%p1005_p10), %s765_s17, 32  }
 0x237   : > { %1323 = vsyncadd (%p1005_p10), %s765_s17, 4294967264  ;;  %s1816_s10 = sadd.s32 4294967294, %s1370_s28  }
 0x238   : > { %s774_s20 = sand.u32 1, %s1816_s10  }
 0x239   : > { %s775_s21 = scalar_lea.sflag [#allocation9], %s774_s20 }
 0x23a   : > { %1325 = dma.done.wait (%p1005_p10), %s775_s21, 64  }
 0x23b   : > { %1327 = vsyncadd (%p1005_p10), %s775_s21, 4294967232  ;;  %s28_s28 = sadd.s32 1, %s1370_s28   ;;  %s1817_s30 = sld [smem:[#allocation16_spill]] }
 0x23c   : > { %p25_p12 = scmp.ge.s32.totalorder %s28_s28, 6   ;;  %s1818_s20 = sld [smem:[#allocation22_spill]] }
 0x23d   : > { %s1819_s8 = sld [smem:[#allocation17_spill]]  ;;  %s1825_s18 = smov %s1334_s19 }
 0x23e   : > { %s1820_s23 = sld [smem:[#allocation23_spill]]  ;;  %s1827_s21 = smov %s1346_s22 }
 0x23f   : > { %s1821_s24 = sld [smem:[#allocation18_spill]]  ;;  %27 = sbr.rel (!%p25_p12) target bundleno = 16 (0x10), region = 148 }
 0x240   : > { %s1822_s25 = sld [smem:[#allocation19_spill]] }
 0x241   : > { %s1823_s26 = sld [smem:[#allocation20_spill]]  ;;  %s1826_s19 = smov %s1817_s30 }
 0x242   : > { %s1824_s27 = sld [smem:[#allocation21_spill]] }
 0x243   : > { %s1828_s22 = smov %s1819_s8 }
 0x244   :  { %798 = vsyncpa [#allocation3], 1 }
 0x245   :  { %800 = vsyncpa [#allocation3 + $0x1], 1 }
 0x246   :  { %801 = vsyncpa [#allocation6], 1 }
 0x247   :  { %803 = vsyncpa [#allocation6 + $0x1], 1 }
 0x248   :  { %804 = vsyncpa [#allocation4], 1 }
 0x249   :  { %806 = vsyncpa [#allocation4 + $0x1], 1 }
 0x24a   :  { %807 = vsyncpa [#allocation9], 1 }
 0x24b   :  { %809 = vsyncpa [#allocation9 + $0x1], 1 }

</bundles_post_ra>
